<compile_context>
chip_gen: v5e
topology: v5e:2x2
jax: 0.10.0
libtpu: 0.0.40
codegen_flags: <defaults>
</compile_context>

<pallas_src>
import math

import jax
import jax.numpy as jnp
from jax.experimental import pallas as pl
from jax.experimental.pallas import tpu as pltpu


def _add_pe_kernel(x_ref, pe_ref, o_ref):
    # x_ref:  (1, TR, LW) tile for one batch element
    # pe_ref: (1, TR, LW) positional-encoding tile (shared across batch)
    # o_ref:  (1, TR, LW) output tile
    o_ref[...] = (x_ref[...] + pe_ref[...]).astype(o_ref.dtype)


def make_positional_encoding(
    d_model: int, max_seq_len: int = 5000, dtype=jnp.float32
) -> jnp.ndarray:
    """Deterministic buffer construction, identical to the PyTorch __init__.

    Build once at module init; pass `dtype` equal to the activation dtype so
    the forward pass never has to re-cast pe per call.
    Handles odd d_model gracefully (cos columns truncated); the PyTorch
    original would raise for odd d_model.
    """
    position = jnp.arange(0, max_seq_len, dtype=jnp.float32)[:, None]          # (L, 1)
    div_term = jnp.exp(
        jnp.arange(0, d_model, 2, dtype=jnp.float32) * (-math.log(10000.0) / d_model)
    )                                                                           # (ceil(D/2),)
    angles = position * div_term                                                # (L, ceil(D/2))
    pe = jnp.zeros((max_seq_len, d_model), dtype=jnp.float32)
    pe = pe.at[:, 0::2].set(jnp.sin(angles))
    pe = pe.at[:, 1::2].set(jnp.cos(angles[:, : d_model // 2]))
    return pe[None, :, :].astype(dtype)                                         # (1, L, D)


def _choose_lane_width(seq_len: int, d_model: int) -> int:
    """Pick a lane width that is a multiple of 128 and divides S*D."""
    total = seq_len * d_model
    if d_model % 128 == 0:
        return d_model
    if total % 128 == 0:
        lw = 128
        while total % (lw * 2) == 0 and lw * 2 <= 2048:
            lw *= 2
        return lw
    # Fallback: keep native layout (masked partial stores; perf-only penalty).
    return d_model


def _vmem_capacity_bytes() -> int:
    """Trace-time VMEM query; conservative (v7x-class, 64 MiB) on failure."""
    try:
        info = pltpu.get_tpu_info()
        for attr in ("vmem_capacity_bytes", "vmem_size_bytes", "vmem_bytes"):
            v = getattr(info, attr, None)
            if v:
                return int(v)
    except Exception:
        pass
    return 64 * 1024 * 1024


def _pick_row_tile(R: int, rows_target: int, sub: int, min_tiles: int) -> int:
    """Row-tile size: multiple of `sub`, prefer dividing R, honor megacore cap."""
    if min_tiles > 1:
        cap = R // min_tiles          # keep >= min_tiles row tiles if possible
        if cap >= sub:
            rows_target = min(rows_target, cap)
    if rows_target >= R:
        return R
    base = max(sub, (rows_target // sub) * sub)
    if base >= R:
        return R
    # Prefer a tile that divides R evenly (no ragged / masked tail tile).
    tr = base
    for _ in range(128):
        if tr < sub:
            break
        if R % tr == 0:
            return tr
        tr -= sub
    return base


def positional_encoding_forward(
    x: jnp.ndarray,
    pe: jnp.ndarray,
    *,
    donate_x: bool = False,
    min_pallas_bytes: int = 4 * 1024 * 1024,
) -> jnp.ndarray:
    """x: (B, S, D); pe: (1, max_seq_len, D).  Returns x + pe[:, :S, :]."""
    B, S, D = x.shape
    assert pe.ndim == 3 and pe.shape[0] == 1 and pe.shape[2] == D and pe.shape[1] >= S
    itemsize = jnp.dtype(x.dtype).itemsize

    if pe.dtype != x.dtype:
        # Per-call cast of only the rows we need.  Prefer caching pe in the
        # activation dtype at init (make_positional_encoding(dtype=...)) so
        # this extra HBM pass never happens.
        pe = pe[:, :S, :].astype(x.dtype)

    # Small-shape fast path: Pallas pipeline prologue + ~0.35 us/step overhead
    # dominate tiny inputs; a fused XLA add is strictly faster.
    if B * S * D * itemsize < min_pallas_bytes:
        return x + pe[:, :S, :]

    # Lane-dense view: (B, S, D) -> (B, R, LW), contiguous reshape (free).
    LW = _choose_lane_width(S, D)
    R = (S * D) // LW

    # Generation-aware tile / VMEM budget.  6 buffers (x, pe, out double
    # buffered) must fit with headroom; v7x (64 MiB VMEM/TC) capped at 48 MiB.
    cap = _vmem_capacity_bytes()
    if cap <= 64 * 1024 * 1024:
        target_tile_bytes = 6 * 1024 * 1024
        vmem_limit = 48 * 1024 * 1024
    else:  # v5e / v6e: 128 MiB physical VMEM
        target_tile_bytes = 12 * 1024 * 1024
        vmem_limit = 96 * 1024 * 1024

    sub = max(8, 32 // itemsize)          # sublane packing: 8 f32, 16 bf16, 32 int8
    rows_target = max(1, target_tile_bytes // (LW * itemsize))
    min_tiles = -(-4 // B)                # keep >= ~4 grid steps for v7x megacore
    TR = _pick_row_tile(R, rows_target, sub, min_tiles)
    num_row_tiles = pl.cdiv(R, TR)

    x3 = x if LW == D else x.reshape(B, R, LW)

    # pe presentation: if TR is a legal tile against the longer pe row extent,
    # pass the full pe buffer (no slice copy) and let the row index_map select
    # rows < R.  Otherwise fall back to an exact (1, R, LW) slice so a
    # full-extent block (TR == R) stays legal.
    L = pe.shape[1]
    if TR % sub == 0 and (L * D) % LW == 0:
        pe3 = pe if LW == D else pe.reshape(1, (L * D) // LW, LW)
    else:
        pe3 = pe[:, :S, :] if LW == D else pe[:, :S, :].reshape(1, R, LW)

    # Batch is the innermost (fastest-varying) grid axis; the pe block index
    # depends only on the row-tile axis, so consecutive batch steps reuse the
    # already-resident pe tile (no re-DMA).
    grid = (num_row_tiles, B)

    out3 = pl.pallas_call(
        _add_pe_kernel,
        out_shape=jax.ShapeDtypeStruct((B, R, LW), x.dtype),
        grid_spec=pltpu.PrefetchScalarGridSpec(
            num_scalar_prefetch=0,
            grid=grid,
            in_specs=[
                pl.BlockSpec((1, TR, LW), lambda r, b: (b, r, 0)),   # x tile
                pl.BlockSpec((1, TR, LW), lambda r, b: (0, r, 0)),   # shared pe tile
            ],
            out_specs=pl.BlockSpec((1, TR, LW), lambda r, b: (b, r, 0)),
        ),
        compiler_params=pltpu.CompilerParams(
            dimension_semantics=("parallel", "parallel"),
            vmem_limit_bytes=vmem_limit,
        ),
        input_output_aliases=({0: 0} if donate_x else {}),
    )(x3, pe3)

    return out3 if LW == D else out3.reshape(B, S, D)


if __name__ == "__main__":
    max_seq_len = 64
    key = jax.random.PRNGKey(0)
    k0, k1, k2 = jax.random.split(key, 3)

    # Case 1: small D (< 128), f32 -> lane-dense reshape path, forced through Pallas.
    B, S, D = 2, 8, 32
    x = jax.random.normal(k0, (B, S, D), dtype=jnp.float32)
    pe = make_positional_encoding(D, max_seq_len)                     # f32, matches x
    out = jax.block_until_ready(
        positional_encoding_forward(x, pe, min_pallas_bytes=0)
    )
    ref = x + pe[:, :S, :]
    assert out.shape == (B, S, D)
    assert jnp.allclose(out, ref, atol=1e-6), "mismatch vs reference (f32, D=32)"

    # Case 2: D multiple of 128, bf16 activations with pe cached in bf16
    # (no per-call slice/astype; full-pe buffer path).
    B2, S2, D2 = 2, 16, 128
    x2 = jax.random.normal(k1, (B2, S2, D2), dtype=jnp.bfloat16)
    pe2 = make_positional_encoding(D2, max_seq_len, dtype=jnp.bfloat16)
    out2 = jax.block_until_ready(
        positional_encoding_forward(x2, pe2, min_pallas_bytes=0)
    )
    ref2 = x2 + pe2[:, :S2, :]
    assert out2.shape == (B2, S2, D2)
    assert jnp.allclose(
        out2.astype(jnp.float32), ref2.astype(jnp.float32), atol=1e-2
    ), "mismatch vs reference (bf16, D=128)"

    # Case 3: default small-shape fast path (plain XLA add, no Pallas launch).
    x3 = jax.random.normal(k2, (B, S, D), dtype=jnp.float32)
    out3 = jax.block_until_ready(positional_encoding_forward(x3, pe))
    assert jnp.allclose(out3, x3 + pe[:, :S, :], atol=1e-6), "fast-path mismatch"

    print("KERNEL_OK")
</pallas_src>

<mosaic_0001>
module attributes {stable_mosaic.version = 11 : i64} {
  func.func @_add_pe_kernel(%arg0: i32, %arg1: i32, %arg2: memref<1x1x256xf32, #tpu.memory_space<vmem>>, %arg3: memref<1x1x256xf32, #tpu.memory_space<vmem>>, %arg4: memref<1x1x256xf32, #tpu.memory_space<vmem>>) attributes {dimension_semantics = [#tpu.dimension_semantics<parallel>, #tpu.dimension_semantics<parallel>], iteration_bounds = array<i64: 1, 2>, scalar_prefetch = 0 : i64, scratch_operands = 0 : i64, tpu.core_type = #tpu.core_type<tc>, window_params = [{transform_indices = @transform_0, window_bounds = array<i64: 1, 1, 256>}, {transform_indices = @transform_1, window_bounds = array<i64: 1, 1, 256>}, {transform_indices = @transform_2, window_bounds = array<i64: 1, 1, 256>}]} {
    %c0 = arith.constant 0 : index
    %c0_0 = arith.constant 0 : index
    %c0_1 = arith.constant 0 : index
    %0 = vector.load %arg2[%c0, %c0_0, %c0_1] : memref<1x1x256xf32, #tpu.memory_space<vmem>>, vector<1x1x256xf32>
    %c0_2 = arith.constant 0 : index
    %c0_3 = arith.constant 0 : index
    %c0_4 = arith.constant 0 : index
    %1 = vector.load %arg3[%c0_2, %c0_3, %c0_4] : memref<1x1x256xf32, #tpu.memory_space<vmem>>, vector<1x1x256xf32>
    %2 = arith.addf %0, %1 : vector<1x1x256xf32>
    %c0_5 = arith.constant 0 : index
    %c0_6 = arith.constant 0 : index
    %c0_7 = arith.constant 0 : index
    %3 = vector.load %arg4[%c0_5, %c0_6, %c0_7] : memref<1x1x256xf32, #tpu.memory_space<vmem>>, vector<1x1x256xf32>
    tpu.vector_store %arg4[%c0_5, %c0_6, %c0_7], %2 {strides = array<i32>} : memref<1x1x256xf32, #tpu.memory_space<vmem>>, vector<1x1x256xf32>,
    return
  }
  func.func @transform_0(%arg0: i32, %arg1: i32) -> (i32, i32, i32) {
    %c0_i32 = arith.constant 0 : i32
    %c0_i32_0 = arith.constant 0 : i32
    return %arg1, %arg0, %c0_i32 : i32, i32, i32
  }
  func.func @transform_1(%arg0: i32, %arg1: i32) -> (i32, i32, i32) {
    %c0_i32 = arith.constant 0 : i32
    %c0_i32_0 = arith.constant 0 : i32
    %c0_i32_1 = arith.constant 0 : i32
    return %c0_i32, %arg0, %c0_i32_0 : i32, i32, i32
  }
  func.func @transform_2(%arg0: i32, %arg1: i32) -> (i32, i32, i32) {
    %c0_i32 = arith.constant 0 : i32
    %c0_i32_0 = arith.constant 0 : i32
    return %arg1, %arg0, %c0_i32 : i32, i32, i32
  }
}

</mosaic_0001>

<bundles_post_ra>
// kernel: tpu_custom_call.1
= control target key start
LH: loop header
LB: loop body
LE: loop exit
PB: predicated region body
PF: predicated region fallthrough
CT: control target
= control target key end

     0   :  { %7 = vsyncpa [#allocation3], 0  ;;  %s722_s0 = inlined_call_operand.hbm [shape: f32[2,1,256], index: 0, kind: input, shape index: {}]   ;;  %s723_s1 = inlined_call_operand.hbm [shape: f32[1,1,256], index: 1, kind: input, shape index: {}]   ;;  %s724_s2 = inlined_call_operand.hbm [shape: f32[2,1,256], index: 2, kind: output, shape index: {}]  }
   0x1   :  { %9 = vsyncpa [#allocation3 + $0x1], 0 }
   0x2   :  { %10 = vsyncpa [#allocation6], 0 }
   0x3   :  { %11 = vsyncpa [#allocation4], 0 }
   0x4   :  { %13 = vsyncpa [#allocation4 + $0x1], 0  ;;  %s573_s9 = smov 0   ;;  %s575_s10 = smov 0  }
   0x5   :  { %s577_s11 = smov 0   ;;  %s579_s12 = smov 0  }
   0x6   :  { %s581_s13 = smov 0   ;;  %s583_s14 = smov 0  }
   0x7 LB: > { %s321_s15 = sadd.s32 4294967295, %s555_s14   ;;  %s322_s16 = sadd.s32 4294967294, %s555_s14   ;;  %s555_s14 = sphi %s583_s14, %s19_s14   ;;  %s551_s13 = sphi %s581_s13, %s736_s13   ;;  %s547_s12 = sphi %s579_s12, %s735_s12   ;;  %s543_s11 = sphi %s577_s11, %s734_s11   ;;  %s539_s10 = sphi %s575_s10, %s733_s10   ;;  %s535_s9 = sphi %s573_s9, %s732_s9  }
   0x8   : > { %p53_p0 = scmp.ne.s32.totalorder %s539_s10, %s535_s9  ;;  %p607_p1 = scmp.eq.s32.totalorder %s321_s15, 0 }
   0x9   : > { %p611_p2 = scmp.eq.s32.totalorder %s321_s15, 1  ;;  %p111_p3 = scmp.eq.s32.totalorder %s322_s16, 1 }
   0xa   : > { %p617_p4 = por %p607_p1, %p53_p0  ;;  %p323_p5 = scmp.ge.s32.totalorder %s555_s14, 1 }
   0xb   : > { %p622_p6 = por %p111_p3, %p53_p0  ;;  %p118_p7 = scmp.lt.s32.totalorder %s555_s14, 3 }
   0xc   : > { %s132_s23 = sshll.u32 %s723_s1, 4  ;;  %p325_p9 = scmp.ge.s32.totalorder %s555_s14, 2  ;;  %s133_s23 = int_to_ptr.hbm [resolvable:$true] %s132_s23 }
   0xd   : > { %p630_p8 = pnand %p323_p5, %p118_p7  ;;  %s557_s25 = smov [#allocation5]  }
   0xe   : > { %s134_s26 = sshll.u32 %s557_s25, 4  ;;  %s28_s27 = sadd.s32 1, %s551_s13  ;;  %s135_s26 = int_to_ptr.vmem [resolvable:$true] %s134_s26 }
   0xf   : > { %p344_p10 = pneg %p630_p8  ;;  %p29_p12 = scmp.ge.s32.totalorder %s28_s27, 2 }
  0x10   : > { %s40_s28 = sadd.s32 1, %s543_s11  ;;  %p47_p13 = scmp.ne.s32.totalorder %s543_s11, %s539_s10 }
  0x11   : > { %p345_p11 = pnand %p344_p10, %p607_p1  ;;  %p48_p0 = scmp.eq.s32.totalorder %s555_s14, 0 }
  0x12   : > { %s738_s27 = smov (%p29_p12, %s28_s27), 0  ;;  %p652_p5 = por %p611_p2, %p47_p13 }
  0x13   : > { %347 = dma.hbm_to_vmem [thread:$0]  (!%p345_p11), %s133_s23, 32, %s135_s26, [#allocation6]  }
  0x14   : > { %p646_p3 = por %p48_p0, %p47_p13  ;;  %s35_s3 = ssub.s32 %s551_s13, %s738_s27 }
  0x15   : > { %p357_p7 = scmp.lt.s32.totalorder %s555_s14, 2  ;;  %p38_p10 = scmp.eq.s32.totalorder %s35_s3, 0 }
  0x16   : > { %s145_s4 = sand.u32 1, %s543_s11   ;;  %s327_s7 = sshll.u32 %s551_s13, 1 }
  0x17   : > { %s326_s5 = sshll.u32 %s145_s4, 1  ;;  %s155_s16 = scalar_lea.hbm %s722_s0, %s327_s7 }
  0x18   : > { %s661_s6 = scalar_select %p38_p10, %s543_s11, %s40_s28  }
  0x19   : > { %s149_s21 = scalar_lea.vmem [#allocation2], %s326_s5  ;;  %s157_s18 = sshll.u32 %s155_s16, 4  ;;  %s158_s18 = int_to_ptr.hbm [resolvable:$true] %s157_s18 }
  0x1a   : > { %s159_s22 = sshll.u32 %s149_s21, 4  ;;  %p349_p2 = pnand %p357_p7, %p646_p3  ;;  %s160_s22 = int_to_ptr.vmem [resolvable:$true] %s159_s22 }
  0x1b   : > { %s146_s23 = scalar_lea.sflag [#allocation3], %s145_s4  ;;  %168 = sbr.rel (%p630_p8) target bundleno = 50 (0x32), region = 28 }
  0x1c   : > { %351 = dma.hbm_to_vmem [thread:$0]  (!%p349_p2), %s158_s18, 32, %s160_s22, %s146_s23  }
  0x1d   : > { %s672_s25 = sand.u32 (!%p630_p8), 1, %s539_s10  }
  0x1e   : > { %s329_s26 = sshll.u32 (!%p630_p8), %s672_s25, 1  ;;  %s171_s28 = scalar_lea.sflag (!%p630_p8), [#allocation3], %s672_s25 }
  0x1f   : > { %s174_s3 = scalar_lea.vmem (!%p630_p8), [#allocation2], %s329_s26 }
  0x20   : > { %522 = dma.done.wait (%p617_p4), %s171_s28, 32  }
  0x21   : > { %524 = vsyncadd (%p617_p4), %s171_s28, 4294967264 }
  0x22   : > { %526 = dma.done.wait (%p607_p1), [#allocation6], 32  }
  0x23   : > { %528 = vsyncadd (%p607_p1), [#allocation6], 4294967264  ;;  %s333_s24 = sshll.u32 %s547_s12, 1  ;;  %v204_v0 = vlaneseq  ;;  %s200_s7 = scalar_lea.vmem [#allocation7], %s329_s26  ;;  %v201_v1 = vld [vmem:[%s174_s3] sm:$0x3] }
  0x24   : > { %s222_s5 = scalar_lea.hbm %s724_s2, %s333_s24  ;;  %s224_s8 = sshll.u32 %s200_s7, 4  ;;  %v202_v2 = vld [vmem:[#allocation5] sm:$0x3]  ;;  %s225_s8 = int_to_ptr.vmem [resolvable:$true] %s224_s8 }
  0x25   : > { %s226_s15 = sshll.u32 %s222_s5, 4  ;;  %vm206_vm0 = vcmp.lt.s32.totalorder %v204_v0, 256  ;;  %v203_v3 = vadd.f32 %v202_v2, %v201_v1  ;;  %s210_s17 = scalar_lea.sflag [#allocation4], %s672_s25  ;;  %s227_s15 = int_to_ptr.hbm [resolvable:$true] %s226_s15 }
  0x26   : > { %s483_s19 = sshra.s32 %s227_s15, 4  ;;  %s489_s22 = scalar_lea.hbm %s724_s2, 4  ;;  %s484_s19 = int_to_ptr.hbm [resolvable:$true] %s483_s19 }
  0x27   : > { %208 = vst.msk [vmem:[%s200_s7] sm:$0x3] %vm206_vm0, %v203_v3  ;;  %s485_s12 = scalar_lea.hbm %s484_s19, 2  ;;  %p490_p11 = scmp.lt.s32.totalorder %s484_s19, %s724_s2 }
  0x28   : > { %p486_p1 = scmp.ne.s32.totalorder %s484_s19, %s485_s12  ;;  %p491_p12 = scmp.lt.s32.totalorder %s489_s22, %s485_s12 }
  0x2a   : > { %p487_p4 = pnand %p486_p1, %p652_p5  ;;  %p492_p13 = por %p491_p12, %p490_p11 }
  0x2c   : > { %p488_p8 = pneg %p487_p4 }
  0x2e   : > { %p493_p0 = pnand %p492_p13, %p488_p8 }
  0x30   : > { %496 = shalt.err (!%p493_p0)
}
  0x31   : > { %342 = dma.vmem_to_hbm [thread:$0]  (%p652_p5), %s225_s8, 32, %s227_s15, %s210_s17  }
  0x32 PF: > { %s238_s25 = sand.u32 1, %s535_s9   ;;  %p353_p3 = pnand %p325_p9, %p622_p6 }
  0x33   : > { %s239_s26 = scalar_lea.sflag [#allocation4], %s238_s25 }
  0x34   : > { %p354_p7 = pneg %p353_p3 }
  0x36   : > { %530 = dma.done.wait (%p354_p7), %s239_s26, 32  }
  0x37   : > { %532 = vsyncadd (%p354_p7), %s239_s26, 4294967264  ;;  %s19_s14 = sadd.s32 1, %s555_s14   ;;  %s732_s9 = smov %s539_s10 }
  0x38   : > { %p16_p10 = scmp.ge.s32.totalorder %s19_s14, 4   ;;  %s733_s10 = smov %s543_s11 }
  0x39   : > { %s734_s11 = smov %s661_s6  ;;  %s735_s12 = smov %s551_s13 }
  0x3a   : > { %s736_s13 = smov %s738_s27  ;;  %18 = sbr.rel (!%p16_p10) target bundleno = 7 (0x7), region = 78 }
  0x3f   :  { %245 = vsyncpa [#allocation3], 1 }
  0x40   :  { %247 = vsyncpa [#allocation3 + $0x1], 1 }
  0x41   :  { %248 = vsyncpa [#allocation6], 1 }
  0x42   :  { %249 = vsyncpa [#allocation4], 1 }
  0x43   :  { %251 = vsyncpa [#allocation4 + $0x1], 1 }

</bundles_post_ra>
